<compile_context>
chip_gen: v7x
topology: tpu7x:2x2x1
jax: 0.10.0
libtpu: 0.0.40
codegen_flags: <defaults>
</compile_context>

<pallas_src>
import jax
import jax.numpy as jnp
from jax.experimental import pallas as pl
from jax.experimental.pallas import tpu as pltpu

BN_EPS = 1e-5

# Conservative budget for the double-buffered in+out tiles of the pipeline.
# 8 MiB stays well under v5e's 16 MiB scoped-VMEM default and v7x's 64 MiB
# physical VMEM while still giving hundreds of 128-lane rows per tile.
_VMEM_TILE_BUDGET = 8 * 1024 * 1024

# Below this many elements a standalone pallas_call's fixed launch/step
# overhead dominates moving the data; let XLA's fused elementwise op win.
_MIN_PALLAS_ELEMS = 1 << 16


def _scale_shift_kernel(x_ref, scale_ref, shift_ref, o_ref):
    """o = x * scale + shift   (eval-mode BatchNorm1d folded into scale/shift).

    x_ref:     (TR, L)  input tile (any float dtype; upcast to f32 for math)
    scale_ref: (1,  L)  f32
    shift_ref: (1,  L)  f32
    o_ref:     (TR, L)  output tile in the requested output dtype
    """
    x = x_ref[...].astype(jnp.float32)
    o_ref[...] = (x * scale_ref[...] + shift_ref[...]).astype(o_ref.dtype)


def _row_tile(n_rows, lane, in_bytes, out_bytes):
    """Largest row-tile (multiple of 8) whose double-buffered in+out fits budget."""
    per_row = lane * (in_bytes + out_bytes) * 2  # x2 for double buffering
    tr = max(8, _VMEM_TILE_BUDGET // max(per_row, 1))
    tr = (tr // 8) * 8
    if tr >= n_rows:
        return n_rows  # single full block (full-extent dims are always legal)
    return tr


def _run_scale_shift(x2d, scale_row, shift_row, out_dtype):
    """Pallas launch: row-tiled elementwise y = x*scale + shift on a 2-D view."""
    R, L = x2d.shape
    tr = _row_tile(R, L, x2d.dtype.itemsize, jnp.dtype(out_dtype).itemsize)
    grid = (pl.cdiv(R, tr),)
    return pl.pallas_call(
        _scale_shift_kernel,
        out_shape=jax.ShapeDtypeStruct((R, L), out_dtype),
        grid_spec=pl.GridSpec(
            grid=grid,
            in_specs=[
                pl.BlockSpec((tr, L), lambda i: (i, 0)),
                pl.BlockSpec((1, L), lambda i: (0, 0)),
                pl.BlockSpec((1, L), lambda i: (0, 0)),
            ],
            out_specs=pl.BlockSpec((tr, L), lambda i: (i, 0)),
        ),
        compiler_params=pltpu.CompilerParams(
            dimension_semantics=("parallel",)),
    )(x2d, scale_row, shift_row)


def identity_embedder_forward(embeddings, gamma, beta, running_mean, running_var,
                              *, head_normalize=True, out_dtype=None,
                              force_pallas=False):
    """Pallas implementation of IdentityEmbedder.forward.

    Args:
      embeddings: (B, D) floating array (f32 or bf16; dtype is preserved).
      gamma, beta, running_mean, running_var: (D,) BatchNorm1d eval params.
      head_normalize: whether the normalizer is applied (config['head_normalize']).
      out_dtype: output dtype; defaults to the input dtype.
      force_pallas: run the Pallas path even for tiny shapes (for testing).

    Returns:
      (B, 1, D) array — second dim is the ensemble size (1).
    """
    if embeddings.ndim != 2:
        raise ValueError(
            "Expected embeddings matrix, got tensor with shape {}".format(embeddings.shape))
    B, D = embeddings.shape
    if out_dtype is None:
        out_dtype = embeddings.dtype
    out_dtype = jnp.dtype(out_dtype)

    if not head_normalize:
        # Normalizer is None -> pure identity + unsqueeze(1).
        return embeddings.astype(out_dtype)[:, None, :]

    # Fold eval-mode BatchNorm1d into a single multiply-add: y = x*scale + shift.
    # One-time O(D) work; done in f32.
    scale = (gamma.astype(jnp.float32) *
             jax.lax.rsqrt(running_var.astype(jnp.float32) + BN_EPS))
    shift = beta.astype(jnp.float32) - running_mean.astype(jnp.float32) * scale

    n = B * D
    if n < _MIN_PALLAS_ELEMS and not force_pallas:
        # Tiny problem: a fused XLA elementwise op beats any standalone kernel.
        y = embeddings.astype(jnp.float32) * scale + shift
        return y.astype(out_dtype)[:, None, :]

    # Choose a lane-dense 2-D view of the contiguous (B, D) buffer.
    if D % 128 == 0:
        x2d = embeddings
        scale_row = scale.reshape(1, D)
        shift_row = shift.reshape(1, D)
    else:
        lane = None
        for cand in (1024, 512, 256, 128):
            if cand % D == 0 and n % cand == 0:
                lane = cand
                break
        if lane is not None:
            # Row-major free view: each L-lane row is lane//D consecutive
            # batch rows, so the params are simply tiled along the lanes.
            x2d = embeddings.reshape(n // lane, lane)
            reps = lane // D
            scale_row = jnp.tile(scale, reps).reshape(1, lane)
            shift_row = jnp.tile(shift, reps).reshape(1, lane)
        else:
            # No clean lane-dense view; full-D block is still legal
            # (lane-sparse stores, but correct).
            x2d = embeddings
            scale_row = scale.reshape(1, D)
            shift_row = shift.reshape(1, D)

    y2d = _run_scale_shift(x2d, scale_row, shift_row, out_dtype)
    # unsqueeze(1): (B, D) -> (B, 1, D); ensemble size 1.
    return y2d.reshape(B, D)[:, None, :]


def _reference(embeddings, gamma, beta, running_mean, running_var):
    x = embeddings.astype(jnp.float32)
    y = (x - running_mean) / jnp.sqrt(running_var + BN_EPS) * gamma + beta
    return y[:, None, :]


if __name__ == "__main__":
    key = jax.random.PRNGKey(0)

    B, D = 8, 32  # D == distribution.num_parameters
    k_x, k_g, k_b, k_m, k_v = jax.random.split(key, 5)
    x = jax.random.normal(k_x, (B, D), dtype=jnp.float32)

    # Deterministic synthetic BatchNorm1d parameters / running stats.
    gamma = 1.0 + 0.1 * jax.random.normal(k_g, (D,), dtype=jnp.float32)
    beta = 0.05 * jax.random.normal(k_b, (D,), dtype=jnp.float32)
    running_mean = 0.1 * jax.random.normal(k_m, (D,), dtype=jnp.float32)
    running_var = 1.0 + 0.1 * jax.random.uniform(k_v, (D,), dtype=jnp.float32)

    ref = _reference(x, gamma, beta, running_mean, running_var)

    # 1) f32 input through the Pallas lane-dense path ((8,32) -> (1,256) view).
    out = jax.block_until_ready(
        identity_embedder_forward(x, gamma, beta, running_mean, running_var,
                                  head_normalize=True, force_pallas=True))
    assert out.shape == (B, 1, D), out.shape
    assert jnp.allclose(out, ref, atol=1e-5, rtol=1e-5), "f32 mismatch vs reference"

    # 2) bf16 input kept bf16 on the wire; f32 math inside the kernel.
    out_bf16 = jax.block_until_ready(
        identity_embedder_forward(x.astype(jnp.bfloat16), gamma, beta,
                                  running_mean, running_var,
                                  head_normalize=True, force_pallas=True))
    assert out_bf16.dtype == jnp.bfloat16
    assert jnp.allclose(out_bf16.astype(jnp.float32), ref, atol=5e-2, rtol=5e-2), \
        "bf16 mismatch vs reference"

    # 3) D multiple of 128 path (direct (B, D) batch-tiled blocks).
    D2 = 128
    x2 = jax.random.normal(jax.random.PRNGKey(1), (16, D2), dtype=jnp.float32)
    g2 = 1.0 + 0.1 * jax.random.normal(jax.random.PRNGKey(2), (D2,), dtype=jnp.float32)
    b2 = 0.05 * jax.random.normal(jax.random.PRNGKey(3), (D2,), dtype=jnp.float32)
    m2 = 0.1 * jax.random.normal(jax.random.PRNGKey(4), (D2,), dtype=jnp.float32)
    v2 = 1.0 + 0.1 * jax.random.uniform(jax.random.PRNGKey(5), (D2,), dtype=jnp.float32)
    out2 = jax.block_until_ready(
        identity_embedder_forward(x2, g2, b2, m2, v2, force_pallas=True))
    ref2 = _reference(x2, g2, b2, m2, v2)
    assert out2.shape == (16, 1, D2)
    assert jnp.allclose(out2, ref2, atol=1e-5, rtol=1e-5), "D=128 mismatch vs reference"

    # 4) head_normalize=False path (pure identity + unsqueeze).
    out_id = jax.block_until_ready(
        identity_embedder_forward(x, gamma, beta, running_mean, running_var,
                                  head_normalize=False))
    assert out_id.shape == (B, 1, D)
    assert jnp.allclose(out_id[:, 0, :], x)

    # 5) Small-shape dispatch (XLA fallback, no Pallas) matches too.
    out_small = jax.block_until_ready(
        identity_embedder_forward(x, gamma, beta, running_mean, running_var))
    assert jnp.allclose(out_small, ref, atol=1e-5, rtol=1e-5)

    print("KERNEL_OK")
</pallas_src>

<mosaic_0001>
module attributes {stable_mosaic.version = 11 : i64} {
  func.func @_scale_shift_kernel(%arg0: i32, %arg1: memref<1x256xf32, #tpu.memory_space<vmem>>, %arg2: memref<1x256xf32, #tpu.memory_space<vmem>>, %arg3: memref<1x256xf32, #tpu.memory_space<vmem>>, %arg4: memref<1x256xf32, #tpu.memory_space<vmem>>) attributes {dimension_semantics = [#tpu.dimension_semantics<parallel>], iteration_bounds = array<i64: 1>, scalar_prefetch = 0 : i64, scratch_operands = 0 : i64, tpu.core_type = #tpu.core_type<tc>, window_params = [{transform_indices = @transform_0, window_bounds = array<i64: 1, 256>}, {pipeline_mode = #tpu.pipeline_mode<synchronous>, transform_indices = @transform_1, window_bounds = array<i64: 1, 256>}, {pipeline_mode = #tpu.pipeline_mode<synchronous>, transform_indices = @transform_2, window_bounds = array<i64: 1, 256>}, {transform_indices = @transform_3, window_bounds = array<i64: 1, 256>}]} {
    %c0 = arith.constant 0 : index
    %c0_0 = arith.constant 0 : index
    %0 = vector.load %arg1[%c0, %c0_0] : memref<1x256xf32, #tpu.memory_space<vmem>>, vector<1x256xf32>
    %c0_1 = arith.constant 0 : index
    %c0_2 = arith.constant 0 : index
    %1 = vector.load %arg2[%c0_1, %c0_2] : memref<1x256xf32, #tpu.memory_space<vmem>>, vector<1x256xf32>
    %2 = arith.mulf %0, %1 : vector<1x256xf32>
    %c0_3 = arith.constant 0 : index
    %c0_4 = arith.constant 0 : index
    %3 = vector.load %arg3[%c0_3, %c0_4] : memref<1x256xf32, #tpu.memory_space<vmem>>, vector<1x256xf32>
    %4 = arith.addf %2, %3 : vector<1x256xf32>
    %c0_5 = arith.constant 0 : index
    %c0_6 = arith.constant 0 : index
    %5 = vector.load %arg4[%c0_5, %c0_6] : memref<1x256xf32, #tpu.memory_space<vmem>>, vector<1x256xf32>
    tpu.vector_store %arg4[%c0_5, %c0_6], %4 {strides = array<i32>} : memref<1x256xf32, #tpu.memory_space<vmem>>, vector<1x256xf32>,
    return
  }
  func.func @transform_0(%arg0: i32) -> (i32, i32) {
    %c0_i32 = arith.constant 0 : i32
    %c0_i32_0 = arith.constant 0 : i32
    return %arg0, %c0_i32 : i32, i32
  }
  func.func @transform_1(%arg0: i32) -> (i32, i32) {
    %c0_i32 = arith.constant 0 : i32
    %c0_i32_0 = arith.constant 0 : i32
    %c0_i32_1 = arith.constant 0 : i32
    return %c0_i32, %c0_i32_0 : i32, i32
  }
  func.func @transform_2(%arg0: i32) -> (i32, i32) {
    %c0_i32 = arith.constant 0 : i32
    %c0_i32_0 = arith.constant 0 : i32
    %c0_i32_1 = arith.constant 0 : i32
    return %c0_i32, %c0_i32_0 : i32, i32
  }
  func.func @transform_3(%arg0: i32) -> (i32, i32) {
    %c0_i32 = arith.constant 0 : i32
    %c0_i32_0 = arith.constant 0 : i32
    return %arg0, %c0_i32 : i32, i32
  }
}

</mosaic_0001>

<bundles_post_ra>
// kernel: tpu_custom_call.1
= control target key start
LH: loop header
LB: loop body
LE: loop exit
PB: predicated region body
PF: predicated region fallthrough
CT: control target
= control target key end

     0   :  { %8 = vsyncpa [#allocation3], 0  ;;  %s154_s0 = inlined_call_operand.hbm [shape: f32[1,256], index: 0, kind: input, shape index: {}]   ;;  %s155_s1 = inlined_call_operand.vmem [shape: f32[1,256], index: 1, kind: input, shape index: {}]   ;;  %s156_s2 = inlined_call_operand.vmem [shape: f32[1,256], index: 2, kind: input, shape index: {}]   ;;  %s157_s3 = inlined_call_operand.hbm [shape: f32[1,256], index: 3, kind: output, shape index: {}]  }
   0x1   :  { %9 = vsyncpa [#allocation4], 0  ;;  %s102_s12 = smov [#allocation2]   ;;  %s54_s16 = scalar_lea.hbm %s154_s0, 32 }
   0x2   :  { %s16_s13 = sshll.u32 %s102_s12, 4  ;;  %p55_p0 = scmp.ne.s32.totalorder %s154_s0, %s54_s16  ;;  %s17_s13 = int_to_ptr.vmem [resolvable:$true] %s16_s13 }
   0x3   :  { %p58_p1 = scmp.lt.u32.totalorder %s54_s16, %s154_s0 }
   0x5   :  { %p60_p2 = pnand %p58_p1, %p55_p0 }
   0x7   :  { %63 = shalt.err (!%p60_p2)
}
   0x8   :  { %s64_s21 = scalar_lea.vmem %s17_s13, 32  ;;  %p69_p4 = scmp.lt.s32.totalorder %s17_s13, %s17_s13 }
   0x9   :  { %p65_p3 = scmp.ne.s32.totalorder %s17_s13, %s64_s21  ;;  %p70_p5 = scmp.lt.s32.totalorder %s64_s21, %s64_s21 }
   0xb   :  { %p71_p6 = por %p70_p5, %p69_p4 }
   0xd   :  { %p72_p7 = pnand %p71_p6, %p65_p3 }
   0xf   :  { %75 = shalt.err (!%p72_p7)
}
  0x10   :  { %19 = dma.hbm_to_vmem [thread:$0]  %s154_s0, 32, %s17_s13, [#allocation3]  }
  0x11   :  { %98 = dma.done.wait [#allocation3], 32  }
  0x12   :  { %99 = vsyncadd [#allocation3], 4294967264  ;;  %v32_v0 = vlaneseq  ;;  %s103_s24 = smov [#allocation5]   ;;  %v27_v1 = vld [vmem:[#allocation2] sm:$0x3] }
  0x13   :  { %s43_s25 = sshll.u32 %s103_s24, 4  ;;  %v28_v2 = vld [vmem:[%s155_s1] sm:$0x3]  ;;  %s44_s25 = int_to_ptr.vmem [resolvable:$true] %s43_s25 }
  0x14   :  { %v30_v3 = vld [vmem:[%s156_s2] sm:$0x3]  ;;  %v29_v4 = vmul.f32 %v28_v2, %v27_v1  ;;  %vm34_vm0 = vcmp.lt.s32.totalorder %v32_v0, 256  ;;  %s76_s0 = scalar_lea.vmem %s44_s25, 32  ;;  %p81_p9 = scmp.lt.s32.totalorder %s44_s25, %s44_s25 }
  0x15   :  { %p77_p8 = scmp.ne.s32.totalorder %s44_s25, %s76_s0  ;;  %p82_p10 = scmp.lt.s32.totalorder %s76_s0, %s76_s0 }
  0x16   :  { %v31_v5 = vadd.f32 %v30_v3, %v29_v4 }
  0x17   :  { %p83_p11 = por %p82_p10, %p81_p9 }
  0x18   :  { %36 = vst.msk [vmem:[#allocation5] sm:$0x3] %vm34_vm0, %v31_v5 }
  0x19   :  { %p84_p12 = pnand %p83_p11, %p77_p8 }
  0x1b   :  { %87 = shalt.err (!%p84_p12)
}
  0x1c   :  { %s88_s1 = scalar_lea.hbm %s157_s3, 32 }
  0x1d   :  { %p89_p13 = scmp.ne.s32.totalorder %s157_s3, %s88_s1  ;;  %p92_p0 = scmp.lt.u32.totalorder %s88_s1, %s157_s3 }
  0x1f   :  { %p94_p1 = pnand %p92_p0, %p89_p13 }
  0x21   :  { %97 = shalt.err (!%p94_p1)
}
  0x22   :  { %46 = dma.vmem_to_hbm [thread:$0]  %s44_s25, 32, %s157_s3, [#allocation4]  }
  0x23   :  { %100 = dma.done.wait [#allocation4], 32  }
  0x24   :  { %101 = vsyncadd [#allocation4], 4294967264 }
  0x25   :  { %50 = vsyncpa [#allocation3], 1 }
  0x26   :  { %51 = vsyncpa [#allocation4], 1 }

</bundles_post_ra>
